<compile_context>
chip_gen: v6e
topology: v6e:2x2x1
jax: 0.10.0
libtpu: 0.0.40
codegen_flags: <defaults>
</compile_context>

<pallas_src>
import jax
import jax.numpy as jnp
from jax.experimental import pallas as pl
from jax.experimental.pallas import tpu as pltpu


def _main_model_kernel(x_ref, g_ref, w1_ref, b1_ref, w2_ref, b2_ref,
                       loss_ref, yhat_ref, scores_ref):
    """Fused forward: one matmul for both feature sets, pairwise loss,
    score concatenation and argmin — all on one VMEM-resident tile.

    Shapes:
      x_ref  : (2B, 8)   -- rows [0,B) = features_id1, rows [B,2B) = features_id2
      g_ref  : (B, 1)    -- golds
      w1_ref : (8, 32), b1_ref : (1, 32)
      w2_ref : (1, 32), b2_ref : (1, 1)
      loss_ref : (1, 1) f32, yhat_ref : (B, 1) i32, scores_ref : (B, 2) f32
    """
    B = g_ref.shape[0]

    x = x_ref[...]                                                     # (2B, 8)

    # Layer 1 for BOTH feature sets in a single MXU push + one bias + one ReLU.
    h = jnp.dot(x, w1_ref[...], preferred_element_type=jnp.float32) + b1_ref[...]
    h = jnp.maximum(h, 0.0)                                            # (2B, 32)

    # Layer 2 (out_features == 1): VPU multiply + lane reduction instead of a
    # single-output-column MXU matmul.
    s = jnp.sum(h * w2_ref[...], axis=-1, keepdims=True) + b2_ref[...]  # (2B, 1)

    s1 = s[:B, :]                                                      # (B, 1)
    s2 = s[B:, :]                                                      # (B, 1)

    # pairwise loss: o = s1 - s2 ; pos = -golds * o + softplus(o) ; mean
    o = s1 - s2
    # numerically stable softplus using only exp/log (exp arg <= 0)
    softplus_o = jnp.maximum(o, 0.0) + jnp.log(1.0 + jnp.exp(-jnp.abs(o)))
    pos = -g_ref[...] * o + softplus_o
    loss_ref[...] = jnp.mean(pos, keepdims=True)                       # (1, 1)

    # scores = cat([s1, s2], dim=1) written with ONE store.
    scores_ref[...] = jnp.concatenate([s1, s2], axis=1)                # (B, 2)

    # y_hat = argmin(scores, dim=-1); ties -> index 0 (matches torch.argmin).
    yhat_ref[...] = jnp.where(s2 < s1, 1, 0).astype(jnp.int32)


def main_model_forward(features_id1, features_id2, golds, w1, b1, w2, b2):
    """Wrapper mirroring MainModel.forward -> (loss, y_hat, scores)."""
    B = features_id1.shape[0]

    # Stack both feature sets so the kernel runs the predictor once on (2B, 8).
    x = jnp.concatenate([features_id1, features_id2], axis=0).astype(jnp.float32)
    g2d = golds.reshape(B, 1).astype(jnp.float32)                      # golds.unsqueeze(-1)

    vmem = pl.BlockSpec(memory_space=pltpu.MemorySpace.VMEM)

    loss, yhat, scores = pl.pallas_call(
        _main_model_kernel,
        out_shape=(
            jax.ShapeDtypeStruct((1, 1), jnp.float32),   # loss (scalar, kept as (1,1))
            jax.ShapeDtypeStruct((B, 1), jnp.int32),     # y_hat
            jax.ShapeDtypeStruct((B, 2), jnp.float32),   # scores
        ),
        in_specs=[vmem] * 6,
        out_specs=(vmem, vmem, vmem),
    )(x, g2d, w1, b1, w2, b2)

    return loss[0, 0], yhat[:, 0], scores


def main_model_reference(features_id1, features_id2, golds, w1, b1, w2, b2):
    """Pure-JAX reference for correctness checking."""
    def predictor(xx):
        h = jnp.maximum(xx @ w1 + b1, 0.0)
        return jnp.sum(h * w2, axis=-1, keepdims=True) + b2
    s1 = predictor(features_id1)
    s2 = predictor(features_id2)
    o = s1 - s2
    pos = -golds.reshape(-1, 1) * o + jax.nn.softplus(o)
    loss = jnp.mean(pos)
    scores = jnp.concatenate([s1, s2], axis=1)
    y_hat = jnp.argmin(scores, axis=-1)
    return loss, y_hat, scores


def init_params(key, input_size=8, hidden_size=32):
    """Deterministic parameter init (PyTorch-Linear-style uniform bounds).

    w1 is stored pre-transposed as (in, hidden); w2 is stored as (1, hidden)
    (the natural PyTorch weight layout for nn.Linear(hidden, 1)).
    """
    k1, k2, k3, k4 = jax.random.split(key, 4)
    bound1 = 1.0 / jnp.sqrt(input_size)
    bound2 = 1.0 / jnp.sqrt(hidden_size)
    w1 = jax.random.uniform(k1, (input_size, hidden_size), jnp.float32, -bound1, bound1)
    b1 = jax.random.uniform(k2, (1, hidden_size), jnp.float32, -bound1, bound1)
    w2 = jax.random.uniform(k3, (1, hidden_size), jnp.float32, -bound2, bound2)
    b2 = jax.random.uniform(k4, (1, 1), jnp.float32, -bound2, bound2)
    return w1, b1, w2, b2


if __name__ == "__main__":
    key = jax.random.PRNGKey(0)
    k_p, k_x1, k_x2, k_g = jax.random.split(key, 4)

    B, INPUT, HIDDEN = 8, 8, 32
    w1, b1, w2, b2 = init_params(k_p, INPUT, HIDDEN)

    features_id1 = jax.random.normal(k_x1, (B, INPUT), jnp.float32)
    features_id2 = jax.random.normal(k_x2, (B, INPUT), jnp.float32)
    # golds in {-1, +1} as in a RankNet-style pairwise setup
    golds = jnp.where(jax.random.bernoulli(k_g, 0.5, (B,)), 1.0, -1.0).astype(jnp.float32)

    loss, y_hat, scores = main_model_forward(
        features_id1, features_id2, golds, w1, b1, w2, b2)
    jax.block_until_ready((loss, y_hat, scores))

    # Shape / sanity checks.
    assert loss.shape == () and y_hat.shape == (B,) and scores.shape == (B, 2)
    assert bool(jnp.isfinite(loss)) and bool(jnp.all(jnp.isfinite(scores)))

    # Loose numerical check against a pure-JAX reference (MXU f32 matmul may
    # use reduced-precision passes, so tolerances are generous).
    ref_loss, ref_yhat, ref_scores = main_model_reference(
        features_id1, features_id2, golds, w1, b1, w2, b2)
    assert jnp.allclose(scores, ref_scores, rtol=5e-2, atol=5e-2)
    assert jnp.allclose(loss, ref_loss, rtol=5e-2, atol=5e-2)

    print("KERNEL_OK")
</pallas_src>

<mosaic_0001>
module attributes {stable_mosaic.version = 11 : i64} {
  func.func @_main_model_kernel(%arg0: memref<16x8xf32, #tpu.memory_space<vmem>>, %arg1: memref<8x1xf32, #tpu.memory_space<vmem>>, %arg2: memref<8x32xf32, #tpu.memory_space<vmem>>, %arg3: memref<1x32xf32, #tpu.memory_space<vmem>>, %arg4: memref<1x32xf32, #tpu.memory_space<vmem>>, %arg5: memref<1x1xf32, #tpu.memory_space<vmem>>, %arg6: memref<1x1xf32, #tpu.memory_space<vmem>>, %arg7: memref<8x1xi32, #tpu.memory_space<vmem>>, %arg8: memref<8x2xf32, #tpu.memory_space<vmem>>) attributes {dimension_semantics = [], scalar_prefetch = 0 : i64, scratch_operands = 0 : i64, tpu.core_type = #tpu.core_type<tc>} {
    %c0 = arith.constant 0 : index
    %c0_0 = arith.constant 0 : index
    %0 = vector.load %arg0[%c0, %c0_0] : memref<16x8xf32, #tpu.memory_space<vmem>>, vector<16x8xf32>
    %c0_1 = arith.constant 0 : index
    %c0_2 = arith.constant 0 : index
    %1 = vector.load %arg2[%c0_1, %c0_2] : memref<8x32xf32, #tpu.memory_space<vmem>>, vector<8x32xf32>
    %cst = arith.constant dense<0.000000e+00> : vector<16x32xf32>
    %2 = tpu.matmul %0, %1, %cst {dimension_numbers = #tpu.dot_dimension_numbers<[1], [0], [0], [1], [0, 0, 1, 1], [], []>} : vector<16x8xf32>, vector<8x32xf32>, vector<16x32xf32> -> vector<16x32xf32>
    %c0_3 = arith.constant 0 : index
    %c0_4 = arith.constant 0 : index
    %3 = vector.load %arg3[%c0_3, %c0_4] : memref<1x32xf32, #tpu.memory_space<vmem>>, vector<1x32xf32>
    %4 = vector.broadcast %3 : vector<1x32xf32> to vector<16x32xf32>
    %5 = arith.addf %2, %4 : vector<16x32xf32>
    %cst_5 = arith.constant 0.000000e+00 : f32
    %6 = vector.broadcast %cst_5 : f32 to vector<16x32xf32>
    %7 = arith.maximumf %5, %6 : vector<16x32xf32>
    %c0_6 = arith.constant 0 : index
    %c0_7 = arith.constant 0 : index
    %8 = vector.load %arg4[%c0_6, %c0_7] : memref<1x32xf32, #tpu.memory_space<vmem>>, vector<1x32xf32>
    %9 = vector.broadcast %8 : vector<1x32xf32> to vector<16x32xf32>
    %10 = arith.mulf %7, %9 : vector<16x32xf32>
    %cst_8 = arith.constant dense<0.000000e+00> : vector<16xf32>
    %11 = vector.multi_reduction <add>, %10, %cst_8 [1] : vector<16x32xf32> to vector<16xf32>
    %12 = vector.shape_cast %11 : vector<16xf32> to vector<16x1xf32>
    %c0_9 = arith.constant 0 : index
    %c0_10 = arith.constant 0 : index
    %13 = vector.load %arg5[%c0_9, %c0_10] : memref<1x1xf32, #tpu.memory_space<vmem>>, vector<1x1xf32>
    %14 = vector.broadcast %13 : vector<1x1xf32> to vector<16x1xf32>
    %15 = arith.addf %12, %14 : vector<16x1xf32>
    %16 = vector.extract_strided_slice %15 {offsets = [0, 0], sizes = [8, 1], strides = [1, 1]} : vector<16x1xf32> to vector<8x1xf32>
    %17 = vector.extract_strided_slice %15 {offsets = [8, 0], sizes = [8, 1], strides = [1, 1]} : vector<16x1xf32> to vector<8x1xf32>
    %18 = arith.subf %16, %17 : vector<8x1xf32>
    %cst_11 = arith.constant 0.000000e+00 : f32
    %19 = vector.broadcast %cst_11 : f32 to vector<8x1xf32>
    %20 = arith.maximumf %18, %19 : vector<8x1xf32>
    %21 = math.absf %18 : vector<8x1xf32>
    %cst_12 = arith.constant 0.000000e+00 : f32
    %22 = vector.broadcast %cst_12 : f32 to vector<8x1xf32>
    %23 = arith.subf %22, %21 : vector<8x1xf32>
    %24 = math.exp %23 : vector<8x1xf32>
    %cst_13 = arith.constant 1.000000e+00 : f32
    %25 = vector.broadcast %cst_13 : f32 to vector<8x1xf32>
    %26 = arith.addf %25, %24 : vector<8x1xf32>
    %27 = math.log %26 : vector<8x1xf32>
    %28 = arith.addf %20, %27 : vector<8x1xf32>
    %c0_14 = arith.constant 0 : index
    %c0_15 = arith.constant 0 : index
    %29 = vector.load %arg1[%c0_14, %c0_15] : memref<8x1xf32, #tpu.memory_space<vmem>>, vector<8x1xf32>
    %cst_16 = arith.constant 0.000000e+00 : f32
    %30 = vector.broadcast %cst_16 : f32 to vector<8x1xf32>
    %31 = arith.subf %30, %29 : vector<8x1xf32>
    %32 = arith.mulf %31, %18 : vector<8x1xf32>
    %33 = arith.addf %32, %28 : vector<8x1xf32>
    %34 = vector.shape_cast %33 : vector<8x1xf32> to vector<1x8x1xf32>
    %cst_17 = arith.constant dense<0.000000e+00> : vector<1xf32>
    %35 = vector.multi_reduction <add>, %34, %cst_17 [1, 2] : vector<1x8x1xf32> to vector<1xf32>
    %36 = vector.shape_cast %35 : vector<1xf32> to vector<1x1x1xf32>
    %37 = vector.extract %36[0, 0, 0] : f32 from vector<1x1x1xf32>
    %38 = vector.broadcast %37 : f32 to vector<1x1xf32>
    %cst_18 = arith.constant 8.000000e+00 : f32
    %39 = vector.broadcast %cst_18 : f32 to vector<1x1xf32>
    %40 = arith.divf %38, %39 : vector<1x1xf32>
    %c0_19 = arith.constant 0 : index
    %c0_20 = arith.constant 0 : index
    %41 = vector.load %arg6[%c0_19, %c0_20] : memref<1x1xf32, #tpu.memory_space<vmem>>, vector<1x1xf32>
    tpu.vector_store %arg6[%c0_19, %c0_20], %40 {strides = array<i32>} : memref<1x1xf32, #tpu.memory_space<vmem>>, vector<1x1xf32>,
    %42 = tpu.concatenate %16, %17 in 1 : vector<8x1xf32>, vector<8x1xf32> -> vector<8x2xf32>
    %c0_21 = arith.constant 0 : index
    %c0_22 = arith.constant 0 : index
    %43 = vector.load %arg8[%c0_21, %c0_22] : memref<8x2xf32, #tpu.memory_space<vmem>>, vector<8x2xf32>
    tpu.vector_store %arg8[%c0_21, %c0_22], %42 {strides = array<i32>} : memref<8x2xf32, #tpu.memory_space<vmem>>, vector<8x2xf32>,
    %44 = arith.cmpf olt, %17, %16 : vector<8x1xf32>
    %c1_i32 = arith.constant 1 : i32
    %c0_i32 = arith.constant 0 : i32
    %45 = vector.broadcast %c1_i32 : i32 to vector<8x1xi32>
    %46 = vector.broadcast %c0_i32 : i32 to vector<8x1xi32>
    %47 = arith.select %44, %45, %46 : vector<8x1xi1>, vector<8x1xi32>
    %c0_23 = arith.constant 0 : index
    %c0_24 = arith.constant 0 : index
    %48 = vector.load %arg7[%c0_23, %c0_24] : memref<8x1xi32, #tpu.memory_space<vmem>>, vector<8x1xi32>
    tpu.vector_store %arg7[%c0_23, %c0_24], %47 {strides = array<i32>} : memref<8x1xi32, #tpu.memory_space<vmem>>, vector<8x1xi32>,
    return
  }
}

</mosaic_0001>

<bundles_post_ra>
// kernel: tpu_custom_call.1
= control target key start
LH: loop header
LB: loop body
LE: loop exit
PB: predicated region body
PF: predicated region fallthrough
CT: control target
= control target key end

     0   :  { %s335_s0 = inlined_call_operand.vmem [shape: f32[16,8], index: 0, kind: input, shape index: {}]   ;;  %s336_s1 = inlined_call_operand.vmem [shape: f32[8,1], index: 1, kind: input, shape index: {}]   ;;  %s337_s2 = inlined_call_operand.vmem [shape: f32[8,32], index: 2, kind: input, shape index: {}]   ;;  %s338_s3 = inlined_call_operand.vmem [shape: f32[1,32], index: 3, kind: input, shape index: {}]   ;;  %s339_s4 = inlined_call_operand.vmem [shape: f32[1,32], index: 4, kind: input, shape index: {}]   ;;  %s340_s5 = inlined_call_operand.<no memory space> [shape: f32[1,1], index: 5, kind: input, shape index: {}]   ;;  %s341_s6 = inlined_call_operand.hbm [shape: f32[1,1], index: 6, kind: output, shape index: {0}]   ;;  %s342_s7 = inlined_call_operand.vmem [shape: s32[8,1], index: 7, kind: output, shape index: {1}]   ;;  %s343_s8 = inlined_call_operand.vmem [shape: f32[8,2], index: 8, kind: output, shape index: {2}]  }
   0x1   :  { %v14_v0 = vstv %s340_s5 }
   0x2   :  { %15 = vst [vmem:[#allocation2] sm:$0x1] %v14_v0 }
   0x3   :  { %v31_v1 = vld [vmem:[%s337_s2] sm:$0xff]  ;;  %vm39_vm0 = vcmask 64512   ;;  %v30_v3 = vld [vmem:[%s335_s0 + $0x8] sm:$0xff] }
   0x4   :  { %v29_v2 = vld [vmem:[%s335_s0] sm:$0xff]  ;;  %218 = vmatprep.subr.mxu0 %v31_v1 }
   0x5   :  { %220 = vmatprep.mubr.msk.f32.mxu0 %vm39_vm0, %v29_v2 }
   0x6   :  { %16 = vsyncpa [#allocation4], 0  ;;  %219 = vmatpush3.msra.mxu0 %v31_v1  ;;  %v210_v4 = vld [vmem:[%s338_s3] ss:$0 sm:$0xff]  ;;  %vm132_vm1 = vcmask 261120   ;;  %vm162_vm2 = vcmask 7168  }
   0x7   :  { %221 = vmatmul.mubr.msk.f32.vlgmr.msra.gmra.mxu0 %vm39_vm0, %v30_v3  ;;  %v213_v11 = vld [vmem:[%s339_s4] ss:$0 sm:$0xff]  ;;  %v254_v22 = vmov 0   ;;  %vm183_vm4 = vcmask 15360   ;;  %s256_s17 = smov [#allocation3]   ;;  %vm176_vm5 = vcmask 0  }
   0x8   :  { %v158_v29 = vld [vmem:[%s336_s1] sm:$0xff]  ;;  %s194_s18 = sshll.u32 %s256_s17, 4  ;;  %s195_s18 = int_to_ptr.vmem [resolvable:$true] %s194_s18 }
   0x9   :  { %v214_v17 = vld [vmem:[#allocation2] ss:$0 sm:$0xff]  ;;  %v159_v30 = vsub.f32 0.0, %v158_v29  ;;  %s232_s20 = scalar_lea.vmem %s195_s18, 16  ;;  %s236_s21 = scalar_lea.vmem %s195_s18, 32 }
   0xa   :  { %p233_p0 = scmp.ne.s32.totalorder %s195_s18, %s232_s20  ;;  %p237_p1 = scmp.lt.s32.totalorder %s195_s18, %s195_s18 }
   0xb   :  { %p238_p2 = scmp.lt.s32.totalorder %s236_s21, %s232_s20 }
   0xd   :  { %p239_p3 = por %p238_p2, %p237_p1 }
   0xf   :  { %p240_p4 = pnand %p239_p3, %p233_p0 }
  0xc7   :  { %v222_v5 = vpop.f32.mrf.mxu0 }
  0xc8   :  { %v118_v6 = vadd.f32 %v222_v5, %v210_v4 }
  0xc9   :  { %v112_v7 = vpop.f32.mrf.mxu0 }
  0xca   :  { %v113_v8 = vadd.f32 %v210_v4, %v112_v7  ;;  %v122_v9 = vmax.f32 %v118_v6, 0.0 }
  0xcc   :  { %v121_v10 = vmax.f32 %v113_v8, 0.0  ;;  %v131_v14 = vmul.f32 %v213_v11, %v122_v9 }
  0xce   :  { %v130_v12 = vmul.f32 %v213_v11, %v121_v10  ;;  %v136_v15 = vsel %vm132_vm1, %v131_v14, 0.0 }
  0xd0   :  { %v133_v13 = vsel %vm132_vm1, %v130_v12, 0.0 }
  0xd1   :  { %134 = vadd.xlane.f32.xlu0 %v133_v13 }
  0xd5   :  { %137 = vadd.xlane.f32.xlu0 %v136_v15 }
 0x15a   :  { %v135_v16 = vpop.xlane.xlu0 %134 }
 0x15b   :  { %v146_v19 = vadd.f32 %v214_v17, %v135_v16 }
 0x15e   :  { %v138_v18 = vpop.xlane.xlu0 %137 }
 0x15f   :  { %v147_v20 = vadd.f32 %v214_v17, %v138_v18 }
 0x161   :  { %v148_v21 = vsub.f32 %v146_v19, %v147_v20  ;;  %vm185_vm3 = vcmp.lt.f32.partialorder %v147_v20, %v146_v19 }
 0x162   :  { %v186_v23 = vsel %vm185_vm3, 1, %v254_v22 }
 0x163   :  { %v150_v24 = vand.u32 2147483647, %v148_v21  ;;  %187 = vst.msk [vmem:[%s342_s7] sm:$0xff] %vm162_vm2, %v186_v23  ;;  %v149_v32 = vmax.f32 %v148_v21, 0.0  ;;  %v160_v35 = vmul.f32 %v159_v30, %v148_v21  ;;  %s255_s7 = smov 1  }
 0x165   :  { %v151_v25 = vsub.f32 0.0, %v150_v24 }
 0x167   :  { %v152_v26 = vmul.f32 1.442695, %v151_v25 }
 0x169   :  { %228 = vpow2.f32 %v152_v26 }
 0x176   :  { %v229_v27 = vpop.eup %228 }
 0x177   :  { %v154_v28 = vadd.f32 1.0, %v229_v27 }
 0x179   :  { %230 = vlog2.f32 %v154_v28 }
 0x186   :  { %v231_v31 = vpop.eup %230 }
 0x187   :  { %v156_v33 = vmul.f32 0.6931472, %v231_v31 }
 0x189   :  { %v157_v34 = vadd.f32 %v156_v33, %v149_v32 }
 0x18b   :  { %v161_v36 = vadd.f32 %v160_v35, %v157_v34 }
 0x18d   :  { %v163_v37 = vsel %vm162_vm2, %v161_v36, 0.0 }
 0x18e   :  { %164 = vadd.xlane.f32.xlu1 %v163_v37 }
 0x19f   :  { %179 = vrot.lane.b32.xlu1 %v147_v20, %s255_s7 }
 0x217   :  { %v165_v38 = vpop.xlane.xlu1 %164 }
 0x218   :  { %v166_v39 = vrot.slane %v165_v38, 4 }
 0x21a   :  { %v167_v40 = vadd.f32 %v166_v39, %v165_v38 }
 0x21b   :  { %v180_v41 = vpop.permute.xlu1 %179 }
 0x21c   :  { %v168_v42 = vrot.slane %v167_v40, 2  ;;  %v182_v43 = vsel %vm162_vm2, %v146_v19, %v180_v41 }
 0x21d   :  { %184 = vst.msk [vmem:[%s343_s8] sm:$0xff] %vm183_vm4, %v182_v43 }
 0x21e   :  { %v169_v44 = vadd.f32 %v168_v42, %v167_v40 }
 0x220   :  { %v170_v45 = vrot.slane %v169_v44, 1 }
 0x222   :  { %v171_v46 = vadd.f32 %v170_v45, %v169_v44 }
 0x224   :  { %223 = vpush %v171_v46 }
 0x255   :  { %s224_s19 = spop %223 }
 0x256   :  { %v173_v47 = vstv %s224_s19 }
 0x257   :  { %v175_v48 = vmul.f32 0.125, %v173_v47 }
 0x259   :  { %177 = vst.msk [vmem:[#allocation3] sm:$0x1] %vm176_vm5, %v175_v48 }
 0x25a   :  { %243 = shalt.err (!%p240_p4)
}
 0x25b   :  { %197 = dma.vmem_to_hbm [thread:$0]  %s195_s18, 16, %s341_s6, [#allocation4]  }
 0x25c   :  { %252 = dma.done.wait [#allocation4], 16  }
 0x25d   :  { %253 = vsyncadd [#allocation4], 4294967280 }
 0x25e   :  { %209 = vsyncpa [#allocation4], 1 }

</bundles_post_ra>
